<compile_context>
chip_gen: v7x
topology: tpu7x:2x2x1
jax: 0.10.0
libtpu: 0.0.40
codegen_flags: <defaults>
</compile_context>

<pallas_src>
import jax
import jax.numpy as jnp
from jax.experimental import pallas as pl
from jax.experimental.pallas import tpu as pltpu


def _round_up(x, m):
    return (x + m - 1) // m * m


def _lstm_kernel(x_ref, h0_ref, c0_ref, wih_ref, whh_ref, b_ref,
                 out_ref, hN_ref, cN_ref, gx_scr):
    S, Bp, Ip = x_ref.shape
    Hp4 = wih_ref.shape[1]
    Hp = Hp4 // 4

    # ---- Phase 1 (non-recurrent): bulk input projection, one MXU matmul ----
    x_all = x_ref[...].reshape(S * Bp, Ip)                      # (S*Bp, Ip)
    gx = jnp.dot(x_all, wih_ref[...], preferred_element_type=jnp.float32)
    gx_scr[...] = (gx + b_ref[...]).reshape(S, Bp, Hp4)         # (S, Bp, 4Hp)

    # ---- Phase 2: sequential time recurrence (the only serial work) --------
    def step(t, carry):
        h, c = carry                                            # (Bp, Hp) each
        gates = gx_scr[t] + jnp.dot(h, whh_ref[...],
                                    preferred_element_type=jnp.float32)
        # Lane-aligned gate slabs (Hp is a multiple of 128). Order: i, f, g, o.
        i_g = jax.nn.sigmoid(gates[:, 0 * Hp:1 * Hp])
        f_g = jax.nn.sigmoid(gates[:, 1 * Hp:2 * Hp])
        g_g = jnp.tanh(gates[:, 2 * Hp:3 * Hp])
        o_g = jax.nn.sigmoid(gates[:, 3 * Hp:4 * Hp])
        c_new = f_g * c + i_g * g_g
        h_new = o_g * jnp.tanh(c_new)
        out_ref[t] = h_new
        return h_new, c_new

    h_fin, c_fin = jax.lax.fori_loop(
        0, S, step, (h0_ref[...], c0_ref[...]), unroll=(S <= 16))

    hN_ref[...] = h_fin
    cN_ref[...] = c_fin


def lstm_forward(x, h0, c0, w_ih, w_hh, b_ih, b_hh):
    """x: (S, B, I), h0/c0: (1, B, H). Returns (output, hidden, cell)."""
    S, B, I = x.shape
    H = h0.shape[-1]

    Bp = _round_up(B, 8)        # sublane alignment
    Ip = _round_up(I, 128)      # lane alignment
    Hp = _round_up(H, 128)      # lane alignment (per-gate)

    # ---- zero-pad activations / state --------------------------------------
    x_p = jnp.zeros((S, Bp, Ip), jnp.float32).at[:, :B, :I].set(x)
    h0_p = jnp.zeros((Bp, Hp), jnp.float32).at[:B, :H].set(h0[0])
    c0_p = jnp.zeros((Bp, Hp), jnp.float32).at[:B, :H].set(c0[0])

    # ---- per-gate padded, pre-transposed weights ---------------------------
    # (4H, X) -> (4, H, X) -> (X, 4, H) -> zero-pad -> (Xp, 4*Hp)
    def pad_weight(w, in_dim, in_pad):
        w4 = w.reshape(4, H, in_dim)
        w4 = jnp.transpose(w4, (2, 0, 1))                       # (X, 4, H)
        wp = jnp.zeros((in_pad, 4, Hp), jnp.float32).at[:in_dim, :, :H].set(w4)
        return wp.reshape(in_pad, 4 * Hp)

    wih_p = pad_weight(w_ih, I, Ip)                             # (Ip, 4*Hp)
    whh_p = pad_weight(w_hh, H, Hp)                             # (Hp, 4*Hp)

    bias = (b_ih + b_hh).reshape(4, H)
    b_p = jnp.zeros((4, Hp), jnp.float32).at[:, :H].set(bias).reshape(1, 4 * Hp)

    out_shapes = (
        jax.ShapeDtypeStruct((S, Bp, Hp), jnp.float32),         # output (padded)
        jax.ShapeDtypeStruct((Bp, Hp), jnp.float32),            # final h
        jax.ShapeDtypeStruct((Bp, Hp), jnp.float32),            # final c
    )

    # Single invocation (grid=(1,)): everything resident in VMEM, the time
    # loop runs inside the kernel. TODO(synk): for long sequences, chunk the
    # time axis (emit_pipeline / manual double-buffered DMA) instead of
    # holding the whole sequence in VMEM.
    grid_spec = pltpu.PrefetchScalarGridSpec(
        num_scalar_prefetch=0,
        grid=(1,),
        in_specs=[
            pl.BlockSpec((S, Bp, Ip), lambda i: (0, 0, 0)),     # x (whole seq)
            pl.BlockSpec((Bp, Hp), lambda i: (0, 0)),           # h0
            pl.BlockSpec((Bp, Hp), lambda i: (0, 0)),           # c0
            pl.BlockSpec((Ip, 4 * Hp), lambda i: (0, 0)),       # W_ih^T (padded)
            pl.BlockSpec((Hp, 4 * Hp), lambda i: (0, 0)),       # W_hh^T (padded)
            pl.BlockSpec((1, 4 * Hp), lambda i: (0, 0)),        # bias
        ],
        out_specs=[
            pl.BlockSpec((S, Bp, Hp), lambda i: (0, 0, 0)),     # output
            pl.BlockSpec((Bp, Hp), lambda i: (0, 0)),           # final h
            pl.BlockSpec((Bp, Hp), lambda i: (0, 0)),           # final c
        ],
        scratch_shapes=[
            pltpu.VMEM((S, Bp, 4 * Hp), jnp.float32),           # G_x buffer
        ],
    )

    out_p, hN_p, cN_p = pl.pallas_call(
        _lstm_kernel,
        out_shape=out_shapes,
        grid_spec=grid_spec,
        compiler_params=pltpu.CompilerParams(
            dimension_semantics=("arbitrary",)),
    )(x_p, h0_p, c0_p, wih_p, whh_p, b_p)

    # ---- strip padding back to the PyTorch shapes --------------------------
    output = out_p[:, :B, :H]                                   # (S, B, H)
    hidden = hN_p[:B, :H][None]                                 # (1, B, H)
    cell = cN_p[:B, :H][None]                                   # (1, B, H)
    return output, hidden, cell


def lstm_reference(x, h0, c0, w_ih, w_hh, b_ih, b_hh):
    """Pure-JAX reference matching torch.nn.LSTM (num_layers=1)."""
    H = h0.shape[-1]
    h, c = h0[0], c0[0]
    outs = []
    for t in range(x.shape[0]):
        gates = x[t] @ w_ih.T + b_ih + h @ w_hh.T + b_hh
        i = jax.nn.sigmoid(gates[:, 0 * H:1 * H])
        f = jax.nn.sigmoid(gates[:, 1 * H:2 * H])
        g = jnp.tanh(gates[:, 2 * H:3 * H])
        o = jax.nn.sigmoid(gates[:, 3 * H:4 * H])
        c = f * c + i * g
        h = o * jnp.tanh(c)
        outs.append(h)
    return jnp.stack(outs), h[None], c[None]


def _make_params(key, input_size, hidden_size):
    kwih, kwhh, kbih, kbhh = jax.random.split(key, 4)
    bound = 1.0 / jnp.sqrt(jnp.float32(hidden_size))
    w_ih = jax.random.uniform(kwih, (4 * hidden_size, input_size),
                              jnp.float32, -bound, bound)
    w_hh = jax.random.uniform(kwhh, (4 * hidden_size, hidden_size),
                              jnp.float32, -bound, bound)
    b_ih = jax.random.uniform(kbih, (4 * hidden_size,),
                              jnp.float32, -bound, bound)
    b_hh = jax.random.uniform(kbhh, (4 * hidden_size,),
                              jnp.float32, -bound, bound)
    return w_ih, w_hh, b_ih, b_hh


def _run_case(key, seq_len, batch_size, input_size, hidden_size):
    kx, kp = jax.random.split(key)
    w_ih, w_hh, b_ih, b_hh = _make_params(kp, input_size, hidden_size)
    x = jax.random.normal(kx, (seq_len, batch_size, input_size), jnp.float32)
    h0 = jnp.zeros((1, batch_size, hidden_size), jnp.float32)
    c0 = jnp.zeros((1, batch_size, hidden_size), jnp.float32)

    out, hidden, cell = lstm_forward(x, h0, c0, w_ih, w_hh, b_ih, b_hh)
    jax.block_until_ready((out, hidden, cell))

    ref_out, ref_h, ref_c = lstm_reference(x, h0, c0, w_ih, w_hh, b_ih, b_hh)
    assert out.shape == (seq_len, batch_size, hidden_size)
    assert hidden.shape == (1, batch_size, hidden_size)
    assert cell.shape == (1, batch_size, hidden_size)
    assert jnp.allclose(out, ref_out, atol=1e-5, rtol=1e-5)
    assert jnp.allclose(hidden, ref_h, atol=1e-5, rtol=1e-5)
    assert jnp.allclose(cell, ref_c, atol=1e-5, rtol=1e-5)


if __name__ == "__main__":
    # Module constants: input_size = len(chars) = 35, hidden_size = 35,
    # num_layers = 1, seq_len = 1, batch_size = 1.
    key = jax.random.PRNGKey(0)
    k1, k2 = jax.random.split(key)

    # Exact module configuration.
    _run_case(k1, seq_len=1, batch_size=1, input_size=35, hidden_size=35)
    # Larger sanity check to exercise the in-kernel time recurrence & padding.
    _run_case(k2, seq_len=8, batch_size=4, input_size=35, hidden_size=35)

    print("KERNEL_OK")
</pallas_src>

<mosaic_0001>
module attributes {stable_mosaic.version = 11 : i64} {
  func.func @_lstm_kernel(%arg0: i32, %arg1: memref<1x8x128xf32, #tpu.memory_space<vmem>>, %arg2: memref<8x128xf32, #tpu.memory_space<vmem>>, %arg3: memref<8x128xf32, #tpu.memory_space<vmem>>, %arg4: memref<128x512xf32, #tpu.memory_space<vmem>>, %arg5: memref<128x512xf32, #tpu.memory_space<vmem>>, %arg6: memref<1x512xf32, #tpu.memory_space<vmem>>, %arg7: memref<1x8x128xf32, #tpu.memory_space<vmem>>, %arg8: memref<8x128xf32, #tpu.memory_space<vmem>>, %arg9: memref<8x128xf32, #tpu.memory_space<vmem>>, %arg10: memref<1x8x512xf32, #tpu.memory_space<vmem>>) attributes {dimension_semantics = [#tpu.dimension_semantics<arbitrary>], iteration_bounds = array<i64: 1>, scalar_prefetch = 0 : i64, scratch_operands = 1 : i64, tpu.core_type = #tpu.core_type<tc>, window_params = [{pipeline_mode = #tpu.pipeline_mode<synchronous>, transform_indices = @transform_0, window_bounds = array<i64: 1, 8, 128>}, {pipeline_mode = #tpu.pipeline_mode<synchronous>, transform_indices = @transform_1, window_bounds = array<i64: 8, 128>}, {pipeline_mode = #tpu.pipeline_mode<synchronous>, transform_indices = @transform_2, window_bounds = array<i64: 8, 128>}, {pipeline_mode = #tpu.pipeline_mode<synchronous>, transform_indices = @transform_3, window_bounds = array<i64: 128, 512>}, {pipeline_mode = #tpu.pipeline_mode<synchronous>, transform_indices = @transform_4, window_bounds = array<i64: 128, 512>}, {pipeline_mode = #tpu.pipeline_mode<synchronous>, transform_indices = @transform_5, window_bounds = array<i64: 1, 512>}, {pipeline_mode = #tpu.pipeline_mode<synchronous>, transform_indices = @transform_6, window_bounds = array<i64: 1, 8, 128>}, {pipeline_mode = #tpu.pipeline_mode<synchronous>, transform_indices = @transform_7, window_bounds = array<i64: 8, 128>}, {pipeline_mode = #tpu.pipeline_mode<synchronous>, transform_indices = @transform_8, window_bounds = array<i64: 8, 128>}]} {
    %c0 = arith.constant 0 : index
    %c0_0 = arith.constant 0 : index
    %c0_1 = arith.constant 0 : index
    %0 = vector.load %arg1[%c0, %c0_0, %c0_1] : memref<1x8x128xf32, #tpu.memory_space<vmem>>, vector<1x8x128xf32>
    %1 = vector.shape_cast %0 : vector<1x8x128xf32> to vector<8x128xf32>
    %c0_2 = arith.constant 0 : index
    %c0_3 = arith.constant 0 : index
    %2 = vector.load %arg4[%c0_2, %c0_3] : memref<128x512xf32, #tpu.memory_space<vmem>>, vector<128x512xf32>
    %cst = arith.constant dense<0.000000e+00> : vector<8x512xf32>
    %3 = tpu.matmul %1, %2, %cst {dimension_numbers = #tpu.dot_dimension_numbers<[1], [0], [0], [1], [0, 0, 1, 1], [], []>} : vector<8x128xf32>, vector<128x512xf32>, vector<8x512xf32> -> vector<8x512xf32>
    %c0_4 = arith.constant 0 : index
    %c0_5 = arith.constant 0 : index
    %4 = vector.load %arg6[%c0_4, %c0_5] : memref<1x512xf32, #tpu.memory_space<vmem>>, vector<1x512xf32>
    %5 = vector.broadcast %4 : vector<1x512xf32> to vector<8x512xf32>
    %6 = arith.addf %3, %5 : vector<8x512xf32>
    %7 = vector.shape_cast %6 : vector<8x512xf32> to vector<1x8x512xf32>
    %c0_6 = arith.constant 0 : index
    %c0_7 = arith.constant 0 : index
    %c0_8 = arith.constant 0 : index
    %8 = vector.load %arg10[%c0_6, %c0_7, %c0_8] : memref<1x8x512xf32, #tpu.memory_space<vmem>>, vector<1x8x512xf32>
    tpu.vector_store %arg10[%c0_6, %c0_7, %c0_8], %7 {strides = array<i32>} : memref<1x8x512xf32, #tpu.memory_space<vmem>>, vector<1x8x512xf32>,
    %c0_9 = arith.constant 0 : index
    %c0_10 = arith.constant 0 : index
    %9 = vector.load %arg2[%c0_9, %c0_10] : memref<8x128xf32, #tpu.memory_space<vmem>>, vector<8x128xf32>
    %c0_11 = arith.constant 0 : index
    %c0_12 = arith.constant 0 : index
    %10 = vector.load %arg3[%c0_11, %c0_12] : memref<8x128xf32, #tpu.memory_space<vmem>>, vector<8x128xf32>
    %c0_i32 = arith.constant 0 : i32
    %11 = arith.index_cast %c0_i32 : i32 to index
    %c0_13 = arith.constant 0 : index
    %c0_14 = arith.constant 0 : index
    %12 = vector.load %arg10[%11, %c0_13, %c0_14] : memref<1x8x512xf32, #tpu.memory_space<vmem>>, vector<1x8x512xf32>
    %13 = vector.shape_cast %12 : vector<1x8x512xf32> to vector<8x512xf32>
    %c0_15 = arith.constant 0 : index
    %c0_16 = arith.constant 0 : index
    %14 = vector.load %arg5[%c0_15, %c0_16] : memref<128x512xf32, #tpu.memory_space<vmem>>, vector<128x512xf32>
    %cst_17 = arith.constant dense<0.000000e+00> : vector<8x512xf32>
    %15 = tpu.matmul %9, %14, %cst_17 {dimension_numbers = #tpu.dot_dimension_numbers<[1], [0], [0], [1], [0, 0, 1, 1], [], []>} : vector<8x128xf32>, vector<128x512xf32>, vector<8x512xf32> -> vector<8x512xf32>
    %16 = arith.addf %13, %15 : vector<8x512xf32>
    %17 = vector.extract_strided_slice %16 {offsets = [0, 0], sizes = [8, 128], strides = [1, 1]} : vector<8x512xf32> to vector<8x128xf32>
    %18 = arith.negf %17 : vector<8x128xf32>
    %19 = math.exp %18 : vector<8x128xf32>
    %cst_18 = arith.constant 1.000000e+00 : f32
    %20 = vector.broadcast %cst_18 : f32 to vector<8x128xf32>
    %21 = arith.addf %20, %19 : vector<8x128xf32>
    %22 = arith.divf %20, %21 : vector<8x128xf32>
    %23 = vector.extract_strided_slice %16 {offsets = [0, 128], sizes = [8, 128], strides = [1, 1]} : vector<8x512xf32> to vector<8x128xf32>
    %24 = arith.negf %23 : vector<8x128xf32>
    %25 = math.exp %24 : vector<8x128xf32>
    %cst_19 = arith.constant 1.000000e+00 : f32
    %26 = vector.broadcast %cst_19 : f32 to vector<8x128xf32>
    %27 = arith.addf %26, %25 : vector<8x128xf32>
    %28 = arith.divf %26, %27 : vector<8x128xf32>
    %29 = vector.extract_strided_slice %16 {offsets = [0, 256], sizes = [8, 128], strides = [1, 1]} : vector<8x512xf32> to vector<8x128xf32>
    %30 = math.tanh %29 : vector<8x128xf32>
    %31 = vector.extract_strided_slice %16 {offsets = [0, 384], sizes = [8, 128], strides = [1, 1]} : vector<8x512xf32> to vector<8x128xf32>
    %32 = arith.negf %31 : vector<8x128xf32>
    %33 = math.exp %32 : vector<8x128xf32>
    %cst_20 = arith.constant 1.000000e+00 : f32
    %34 = vector.broadcast %cst_20 : f32 to vector<8x128xf32>
    %35 = arith.addf %34, %33 : vector<8x128xf32>
    %36 = arith.divf %34, %35 : vector<8x128xf32>
    %37 = arith.mulf %28, %10 : vector<8x128xf32>
    %38 = arith.mulf %22, %30 : vector<8x128xf32>
    %39 = arith.addf %37, %38 : vector<8x128xf32>
    %40 = math.tanh %39 : vector<8x128xf32>
    %41 = arith.mulf %36, %40 : vector<8x128xf32>
    %42 = arith.index_cast %c0_i32 : i32 to index
    %c0_21 = arith.constant 0 : index
    %c0_22 = arith.constant 0 : index
    %43 = vector.load %arg7[%42, %c0_21, %c0_22] : memref<1x8x128xf32, #tpu.memory_space<vmem>>, vector<1x8x128xf32>
    %44 = vector.shape_cast %43 : vector<1x8x128xf32> to vector<8x128xf32>
    %45 = vector.shape_cast %41 : vector<8x128xf32> to vector<1x8x128xf32>
    tpu.vector_store %arg7[%42, %c0_21, %c0_22], %45 {strides = array<i32>} : memref<1x8x128xf32, #tpu.memory_space<vmem>>, vector<1x8x128xf32>,
    %c1_i32 = arith.constant 1 : i32
    %c0_23 = arith.constant 0 : index
    %c0_24 = arith.constant 0 : index
    %46 = vector.load %arg8[%c0_23, %c0_24] : memref<8x128xf32, #tpu.memory_space<vmem>>, vector<8x128xf32>
    tpu.vector_store %arg8[%c0_23, %c0_24], %41 {strides = array<i32>} : memref<8x128xf32, #tpu.memory_space<vmem>>, vector<8x128xf32>,
    %c0_25 = arith.constant 0 : index
    %c0_26 = arith.constant 0 : index
    %47 = vector.load %arg9[%c0_25, %c0_26] : memref<8x128xf32, #tpu.memory_space<vmem>>, vector<8x128xf32>
    tpu.vector_store %arg9[%c0_25, %c0_26], %39 {strides = array<i32>} : memref<8x128xf32, #tpu.memory_space<vmem>>, vector<8x128xf32>,
    return
  }
  func.func @transform_0(%arg0: i32) -> (i32, i32, i32) {
    %c0_i32 = arith.constant 0 : i32
    %c0_i32_0 = arith.constant 0 : i32
    %c0_i32_1 = arith.constant 0 : i32
    %c0_i32_2 = arith.constant 0 : i32
    return %c0_i32, %c0_i32_0, %c0_i32_1 : i32, i32, i32
  }
  func.func @transform_1(%arg0: i32) -> (i32, i32) {
    %c0_i32 = arith.constant 0 : i32
    %c0_i32_0 = arith.constant 0 : i32
    %c0_i32_1 = arith.constant 0 : i32
    return %c0_i32, %c0_i32_0 : i32, i32
  }
  func.func @transform_2(%arg0: i32) -> (i32, i32) {
    %c0_i32 = arith.constant 0 : i32
    %c0_i32_0 = arith.constant 0 : i32
    %c0_i32_1 = arith.constant 0 : i32
    return %c0_i32, %c0_i32_0 : i32, i32
  }
  func.func @transform_3(%arg0: i32) -> (i32, i32) {
    %c0_i32 = arith.constant 0 : i32
    %c0_i32_0 = arith.constant 0 : i32
    %c0_i32_1 = arith.constant 0 : i32
    return %c0_i32, %c0_i32_0 : i32, i32
  }
  func.func @transform_4(%arg0: i32) -> (i32, i32) {
    %c0_i32 = arith.constant 0 : i32
    %c0_i32_0 = arith.constant 0 : i32
    %c0_i32_1 = arith.constant 0 : i32
    return %c0_i32, %c0_i32_0 : i32, i32
  }
  func.func @transform_5(%arg0: i32) -> (i32, i32) {
    %c0_i32 = arith.constant 0 : i32
    %c0_i32_0 = arith.constant 0 : i32
    %c0_i32_1 = arith.constant 0 : i32
    return %c0_i32, %c0_i32_0 : i32, i32
  }
  func.func @transform_6(%arg0: i32) -> (i32, i32, i32) {
    %c0_i32 = arith.constant 0 : i32
    %c0_i32_0 = arith.constant 0 : i32
    %c0_i32_1 = arith.constant 0 : i32
    %c0_i32_2 = arith.constant 0 : i32
    return %c0_i32, %c0_i32_0, %c0_i32_1 : i32, i32, i32
  }
  func.func @transform_7(%arg0: i32) -> (i32, i32) {
    %c0_i32 = arith.constant 0 : i32
    %c0_i32_0 = arith.constant 0 : i32
    %c0_i32_1 = arith.constant 0 : i32
    return %c0_i32, %c0_i32_0 : i32, i32
  }
  func.func @transform_8(%arg0: i32) -> (i32, i32) {
    %c0_i32 = arith.constant 0 : i32
    %c0_i32_0 = arith.constant 0 : i32
    %c0_i32_1 = arith.constant 0 : i32
    return %c0_i32, %c0_i32_0 : i32, i32
  }
}

</mosaic_0001>

<bundles_post_ra>
// kernel: tpu_custom_call.1
= control target key start
LH: loop header
LB: loop body
LE: loop exit
PB: predicated region body
PF: predicated region fallthrough
CT: control target
= control target key end

     0   :  { %14 = vsyncpa [#allocation4], 0  ;;  %s1148_s0 = inlined_call_operand.hbm [shape: f32[1,8,128], index: 0, kind: input, shape index: {}]   ;;  %s1149_s1 = inlined_call_operand.hbm [shape: f32[8,128], index: 1, kind: input, shape index: {}]   ;;  %s1150_s2 = inlined_call_operand.hbm [shape: f32[8,128], index: 2, kind: input, shape index: {}]   ;;  %s1151_s3 = inlined_call_operand.hbm [shape: f32[128,512], index: 3, kind: input, shape index: {}]   ;;  %s1152_s4 = inlined_call_operand.hbm [shape: f32[128,512], index: 4, kind: input, shape index: {}]   ;;  %s1153_s5 = inlined_call_operand.vmem [shape: f32[1,512], index: 5, kind: input, shape index: {}]   ;;  %s1154_s6 = inlined_call_operand.hbm [shape: f32[1,8,128], index: 6, kind: output, shape index: {0}]   ;;  %s1155_s7 = inlined_call_operand.hbm [shape: f32[8,128], index: 7, kind: output, shape index: {1}]   ;;  %s1156_s8 = inlined_call_operand.hbm [shape: f32[8,128], index: 8, kind: output, shape index: {2}]  }
   0x1   :  { %15 = vsyncpa [#allocation7], 0 }
   0x2   :  { %16 = vsyncpa [#allocation10], 0 }
   0x3   :  { %17 = vsyncpa [#allocation5], 0 }
   0x4   :  { %18 = vsyncpa [#allocation14], 0  ;;  %s962_s27 = smov [#allocation6]   ;;  %s963_s29 = smov [#allocation9]  }
   0x5   :  { %s35_s28 = sshll.u32 %s962_s27, 4  ;;  %s54_s30 = sshll.u32 %s963_s29, 4  ;;  %s36_s28 = int_to_ptr.vmem [resolvable:$true] %s35_s28  ;;  %s1018_s30 = int_to_ptr.vmem [resolvable:$true] %s54_s30 }
   0x6   :  { %s776_s11 = scalar_lea.hbm %s1149_s1, 128 }
   0x7   :  { %p777_p0 = scmp.ne.s32.totalorder %s1149_s1, %s776_s11  ;;  %p780_p1 = scmp.lt.u32.totalorder %s776_s11, %s1149_s1 }
   0x9   :  { %p782_p2 = pnand %p780_p1, %p777_p0 }
   0xb   :  { %785 = shalt.err (!%p782_p2)
}
   0xc   :  { %s786_s16 = scalar_lea.vmem %s36_s28, 128  ;;  %p791_p4 = scmp.lt.s32.totalorder %s36_s28, %s36_s28 }
   0xd   :  { %p787_p3 = scmp.ne.s32.totalorder %s36_s28, %s786_s16  ;;  %p792_p5 = scmp.lt.s32.totalorder %s786_s16, %s786_s16 }
   0xf   :  { %p793_p6 = por %p792_p5, %p791_p4 }
  0x11   :  { %p794_p7 = pnand %p793_p6, %p787_p3 }
  0x13   :  { %797 = shalt.err (!%p794_p7)
}
  0x14   :  { %38 = dma.hbm_to_vmem [thread:$0]  %s1149_s1, 128, %s36_s28, [#allocation7]  }
  0x15   :  { %s798_s21 = scalar_lea.hbm %s1151_s3, 8192 }
  0x16   :  { %p799_p8 = scmp.ne.s32.totalorder %s1151_s3, %s798_s21  ;;  %p802_p9 = scmp.lt.u32.totalorder %s798_s21, %s1151_s3 }
  0x18   :  { %p804_p10 = pnand %p802_p9, %p799_p8 }
  0x1a   :  { %807 = shalt.err (!%p804_p10)
}
  0x1b   :  { %s808_s26 = scalar_lea.vmem %s1018_s30, 8192  ;;  %p813_p12 = scmp.lt.s32.totalorder %s1018_s30, %s1018_s30 }
  0x1c   :  { %p809_p11 = scmp.ne.s32.totalorder %s1018_s30, %s808_s26  ;;  %p814_p13 = scmp.lt.s32.totalorder %s808_s26, %s808_s26 }
  0x1e   :  { %p815_p0 = por %p814_p13, %p813_p12 }
  0x20   :  { %p816_p1 = pnand %p815_p0, %p809_p11 }
  0x22   :  { %819 = shalt.err (!%p816_p1)
}
  0x23   :  { %s964_s1 = smov 512   ;;  %s965_s27 = smov 32  }
  0x24   :  { %60 = dma.hbm_to_vmem [thread:$0]  %s1151_s3, 8192, %s1018_s30, [#allocation10], %s964_s1, %s964_s1, %s965_s27  }
  0x25   :  { %s966_s9 = smov [#allocation3]   ;;  %s967_s11 = smov [#allocation8]  }
  0x26   :  { %s25_s10 = sshll.u32 %s966_s9, 4  ;;  %s45_s12 = sshll.u32 %s967_s11, 4  ;;  %s26_s10 = int_to_ptr.vmem [resolvable:$true] %s25_s10  ;;  %s46_s12 = int_to_ptr.vmem [resolvable:$true] %s45_s12 }
  0x27   :  { %s820_s15 = scalar_lea.hbm %s1148_s0, 128 }
  0x28   :  { %p821_p2 = scmp.ne.s32.totalorder %s1148_s0, %s820_s15  ;;  %p824_p3 = scmp.lt.u32.totalorder %s820_s15, %s1148_s0 }
  0x2a   :  { %p826_p4 = pnand %p824_p3, %p821_p2 }
  0x2c   :  { %829 = shalt.err (!%p826_p4)
}
  0x2d   :  { %s830_s3 = scalar_lea.vmem %s26_s10, 128  ;;  %p835_p6 = scmp.lt.s32.totalorder %s26_s10, %s26_s10 }
  0x2e   :  { %p831_p5 = scmp.ne.s32.totalorder %s26_s10, %s830_s3  ;;  %p836_p7 = scmp.lt.s32.totalorder %s830_s3, %s830_s3 }
  0x30   :  { %p837_p8 = por %p836_p7, %p835_p6 }
  0x32   :  { %p838_p9 = pnand %p837_p8, %p831_p5 }
  0x34   :  { %841 = shalt.err (!%p838_p9)
}
  0x35   :  { %28 = dma.hbm_to_vmem [thread:$0]  %s1148_s0, 128, %s26_s10, [#allocation4]  }
  0x36   :  { %s842_s23 = scalar_lea.hbm %s1150_s2, 128 }
  0x37   :  { %p843_p10 = scmp.ne.s32.totalorder %s1150_s2, %s842_s23  ;;  %p846_p11 = scmp.lt.u32.totalorder %s842_s23, %s1150_s2 }
  0x39   :  { %p848_p12 = pnand %p846_p11, %p843_p10 }
  0x3b   :  { %851 = shalt.err (!%p848_p12)
}
  0x3c   :  { %s852_s29 = scalar_lea.vmem %s46_s12, 128  ;;  %p857_p0 = scmp.lt.s32.totalorder %s46_s12, %s46_s12 }
  0x3d   :  { %p853_p13 = scmp.ne.s32.totalorder %s46_s12, %s852_s29  ;;  %p858_p1 = scmp.lt.s32.totalorder %s852_s29, %s852_s29 }
  0x3f   :  { %p859_p2 = por %p858_p1, %p857_p0 }
  0x41   :  { %p860_p3 = pnand %p859_p2, %p853_p13 }
  0x43   :  { %863 = shalt.err (!%p860_p3)
}
  0x44   :  { %48 = dma.hbm_to_vmem [thread:$0]  %s1150_s2, 128, %s46_s12, [#allocation7]  }
  0x45   :  { %s968_s10 = smov [#allocation11]   ;;  %s864_s15 = scalar_lea.hbm %s1152_s4, 8192 }
  0x46   :  { %s66_s11 = sshll.u32 %s968_s10, 4  ;;  %p865_p4 = scmp.ne.s32.totalorder %s1152_s4, %s864_s15  ;;  %s67_s11 = int_to_ptr.vmem [resolvable:$true] %s66_s11 }
  0x47   :  { %p868_p5 = scmp.lt.u32.totalorder %s864_s15, %s1152_s4 }
  0x49   :  { %p870_p6 = pnand %p868_p5, %p865_p4 }
  0x4b   :  { %873 = shalt.err (!%p870_p6)
}
  0x4c   :  { %s874_s3 = scalar_lea.vmem %s67_s11, 8192  ;;  %p879_p8 = scmp.lt.s32.totalorder %s67_s11, %s67_s11 }
  0x4d   :  { %p875_p7 = scmp.ne.s32.totalorder %s67_s11, %s874_s3  ;;  %p880_p9 = scmp.lt.s32.totalorder %s874_s3, %s874_s3 }
  0x4f   :  { %p881_p10 = por %p880_p9, %p879_p8 }
  0x51   :  { %p882_p11 = pnand %p881_p10, %p875_p7 }
  0x53   :  { %885 = shalt.err (!%p882_p11)
}
  0x54   :  { %72 = dma.hbm_to_vmem [thread:$0]  %s1152_s4, 8192, %s67_s11, [#allocation10], %s964_s1, %s964_s1, %s965_s27  }
  0x55   :  { %952 = dma.done.wait [#allocation4], 128  }
  0x56   :  { %953 = vsyncadd [#allocation4], 4294967168 }
  0x57   :  { %954 = dma.done.wait [#allocation7], 256  }
  0x58   :  { %955 = vsyncadd [#allocation7], 4294967040 }
  0x59   :  { %956 = dma.done.wait [#allocation10], 16384  }
  0x5a   :  { %957 = vsyncadd [#allocation10], 4294950912  ;;  %v969_v0 = vmov 0.0   ;;  %v92_v1 = vld [vmem:[#allocation9 + $0x8] sm:$0xff]  ;;  %v94_v3 = vld [vmem:[#allocation9 + $0x18] sm:$0xff]  ;;  %s971_s30 = smov [#allocation12]  }
  0x5b   :  { %241 = vmatprep.mubr.f32.mxu0 %v969_v0  ;;  %312 = vmatprep.mubr.f32.mxu1 %v969_v0  ;;  %v96_v2 = vld [vmem:[#allocation9 + $0x28] sm:$0xff]  ;;  %v98_v5 = vld [vmem:[#allocation9 + $0x38] sm:$0xff]  ;;  %v91_v6 = vld [vmem:[#allocation9] sm:$0xff]  ;;  %s572_s20 = sshll.u32 %s971_s30, 4  ;;  %s972_s21 = smov [#allocation15]   ;;  %s1098_s20 = int_to_ptr.vmem [resolvable:$true] %s572_s20 }
  0x5c   :  { %v613_v4 = vpack.c.bf16 %v96_v2, %v92_v1  ;;  %v95_v7 = vld [vmem:[#allocation9 + $0x20] sm:$0xff]  ;;  %v645_v8 = vpack.c.bf16 %v98_v5, %v94_v3  ;;  %v93_v10 = vld [vmem:[#allocation9 + $0x10] sm:$0xff]  ;;  %v100_v12 = vld [vmem:[#allocation9 + $0x48] sm:$0xff]  ;;  %s592_s22 = sshll.u32 %s972_s21, 4  ;;  %s1100_s22 = int_to_ptr.vmem [resolvable:$true] %s592_s22 }
  0x5d   :  { %v615_v9 = vpack.c.bf16 %v95_v7, %v91_v6  ;;  %v97_v11 = vld [vmem:[#allocation9 + $0x30] sm:$0xff]  ;;  %v104_v14 = vld [vmem:[#allocation9 + $0x68] sm:$0xff]  ;;  %v102_v15 = vld [vmem:[#allocation9 + $0x58] sm:$0xff] }
  0x5e   :  { %614 = vmatprep.subr.bf16.mxu0 %v613_v4  ;;  %v647_v13 = vpack.c.bf16 %v97_v11, %v93_v10  ;;  %v106_v16 = vld [vmem:[#allocation9 + $0x78] sm:$0xff]  ;;  %646 = vmatprep.subr.bf16.mxu1 %v645_v8  ;;  %v617_v17 = vpack.c.bf16 %v104_v14, %v100_v12  ;;  %v99_v19 = vld [vmem:[#allocation9 + $0x40] sm:$0xff]  ;;  %v101_v21 = vld [vmem:[#allocation9 + $0x50] sm:$0xff] }
  0x5f   :  { %616 = vmatpush1.bf16.msra.mxu0 %v615_v9  ;;  %v649_v18 = vpack.c.bf16 %v106_v16, %v102_v15  ;;  %v103_v20 = vld [vmem:[#allocation9 + $0x60] sm:$0xff]  ;;  %v105_v23 = vld [vmem:[#allocation9 + $0x70] sm:$0xff]  ;;  %v108_v24 = vld [vmem:[#allocation9 + $0x88] sm:$0xff] }
  0x60   :  { %648 = vmatpush1.bf16.msra.mxu1 %v647_v13  ;;  %v619_v22 = vpack.c.bf16 %v103_v20, %v99_v19  ;;  %v112_v25 = vld [vmem:[#allocation9 + $0xa8] sm:$0xff]  ;;  %618 = vmatprep.subr.bf16.mxu0 %v617_v17  ;;  %v651_v26 = vpack.c.bf16 %v105_v23, %v101_v21  ;;  %v110_v28 = vld [vmem:[#allocation9 + $0x98] sm:$0xff]  ;;  %v107_v30 = vld [vmem:[#allocation9 + $0x80] sm:$0xff] }
  0x61   :  { %650 = vmatprep.subr.bf16.mxu1 %v649_v18  ;;  %v621_v27 = vpack.c.bf16 %v112_v25, %v108_v24  ;;  %v114_v29 = vld [vmem:[#allocation9 + $0xb8] sm:$0xff]  ;;  %v111_v32 = vld [vmem:[#allocation9 + $0xa0] sm:$0xff]  ;;  %v109_v33 = vld [vmem:[#allocation9 + $0x90] sm:$0xff] }
  0x62   :  { %v653_v31 = vpack.c.bf16 %v114_v29, %v110_v28  ;;  %v113_v34 = vld [vmem:[#allocation9 + $0xb0] sm:$0xff]  ;;  %v623_v35 = vpack.c.bf16 %v111_v32, %v107_v30  ;;  %v116_v36 = vld [vmem:[#allocation9 + $0xc8] sm:$0xff]  ;;  %v118_v38 = vld [vmem:[#allocation9 + $0xd8] sm:$0xff] }
  0x63   :  { %620 = vmatpush1.bf16.msra.mxu0 %v619_v22  ;;  %v120_v37 = vld [vmem:[#allocation9 + $0xe8] sm:$0xff]  ;;  %v655_v39 = vpack.c.bf16 %v113_v34, %v109_v33  ;;  %v122_v41 = vld [vmem:[#allocation9 + $0xf8] sm:$0xff]  ;;  %v115_v42 = vld [vmem:[#allocation9 + $0xc0] sm:$0xff] }
  0x64   :  { %652 = vmatpush1.bf16.msra.mxu1 %v651_v26  ;;  %622 = vmatprep.subr.bf16.mxu0 %v621_v27  ;;  %v625_v40 = vpack.c.bf16 %v120_v37, %v116_v36  ;;  %v119_v43 = vld [vmem:[#allocation9 + $0xe0] sm:$0xff]  ;;  %v657_v44 = vpack.c.bf16 %v122_v41, %v118_v38  ;;  %v117_v45 = vld [vmem:[#allocation9 + $0xd0] sm:$0xff]  ;;  %v124_v47 = vld [vmem:[#allocation9 + $0x108] sm:$0xff] }
  0x65   :  { %654 = vmatprep.subr.bf16.mxu1 %v653_v31  ;;  %v121_v46 = vld [vmem:[#allocation9 + $0xf0] sm:$0xff]  ;;  %v128_v48 = vld [vmem:[#allocation9 + $0x128] sm:$0xff]  ;;  %v126_v49 = vld [vmem:[#allocation9 + $0x118] sm:$0xff]  ;;  %v627_v51 = vpack.c.bf16 %v119_v43, %v115_v42 }
  0x66   :  { %v130_v50 = vld [vmem:[#allocation9 + $0x138] sm:$0xff]  ;;  %v659_v52 = vpack.c.bf16 %v121_v46, %v117_v45  ;;  %v629_v53 = vpack.c.bf16 %v128_v48, %v124_v47  ;;  %v123_v54 = vld [vmem:[#allocation9 + $0x100] sm:$0xff]  ;;  %v125_v56 = vld [vmem:[#allocation9 + $0x110] sm:$0xff] }
  0x67   :  { %624 = vmatpush1.bf16.msra.mxu0 %v623_v35  ;;  %v127_v55 = vld [vmem:[#allocation9 + $0x120] sm:$0xff]  ;;  %v661_v57 = vpack.c.bf16 %v130_v50, %v126_v49  ;;  %v129_v58 = vld [vmem:[#allocation9 + $0x130] sm:$0xff]  ;;  %v132_v59 = vld [vmem:[#allocation9 + $0x148] sm:$0xff] }
  0x68   :  { %656 = vmatpush1.bf16.msra.mxu1 %v655_v39  ;;  %626 = vmatprep.subr.bf16.mxu0 %v625_v40  ;;  %v136_v60 = vld [vmem:[#allocation9 + $0x168] sm:$0xff]  ;;  %v134_v61 = vld [vmem:[#allocation9 + $0x158] sm:$0xff]  ;;  %v631_v63 = vpack.c.bf16 %v127_v55, %v123_v54  ;;  %v663_v1 = vpack.c.bf16 %v129_v58, %v125_v56  ;;  %v131_v3 = vld [vmem:[#allocation9 + $0x140] sm:$0xff] }
  0x69   :  { %658 = vmatprep.subr.bf16.mxu1 %v657_v44  ;;  %v138_v62 = vld [vmem:[#allocation9 + $0x178] sm:$0xff]  ;;  %v633_v2 = vpack.c.bf16 %v136_v60, %v132_v59  ;;  %v135_v4 = vld [vmem:[#allocation9 + $0x160] sm:$0xff]  ;;  %v133_v5 = vld [vmem:[#allocation9 + $0x150] sm:$0xff] }
  0x6a   :  { %v665_v6 = vpack.c.bf16 %v138_v62, %v134_v61  ;;  %v137_v7 = vld [vmem:[#allocation9 + $0x170] sm:$0xff]  ;;  %v140_v8 = vld [vmem:[#allocation9 + $0x188] sm:$0xff]  ;;  %v142_v10 = vld [vmem:[#allocation9 + $0x198] sm:$0xff]  ;;  %v635_v12 = vpack.c.bf16 %v135_v4, %v131_v3 }
  0x6b   :  { %628 = vmatpush1.bf16.msra.mxu0 %v627_v51  ;;  %v144_v9 = vld [vmem:[#allocation9 + $0x1a8] sm:$0xff]  ;;  %v146_v11 = vld [vmem:[#allocation9 + $0x1b8] sm:$0xff]  ;;  %v667_v13 = vpack.c.bf16 %v137_v7, %v133_v5  ;;  %v139_v15 = vld [vmem:[#allocation9 + $0x180] sm:$0xff] }
  0x6c   :  { %660 = vmatpush1.bf16.msra.mxu1 %v659_v52  ;;  %630 = vmatprep.subr.bf16.mxu0 %v629_v53  ;;  %v637_v14 = vpack.c.bf16 %v144_v9, %v140_v8  ;;  %v143_v16 = vld [vmem:[#allocation9 + $0x1a0] sm:$0xff]  ;;  %v141_v17 = vld [vmem:[#allocation9 + $0x190] sm:$0xff]  ;;  %v669_v18 = vpack.c.bf16 %v146_v11, %v142_v10  ;;  %v148_v20 = vld [vmem:[#allocation9 + $0x1c8] sm:$0xff] }
  0x6d   :  { %662 = vmatprep.subr.bf16.mxu1 %v661_v57  ;;  %v145_v19 = vld [vmem:[#allocation9 + $0x1b0] sm:$0xff]  ;;  %v152_v21 = vld [vmem:[#allocation9 + $0x1e8] sm:$0xff]  ;;  %v150_v22 = vld [vmem:[#allocation9 + $0x1d8] sm:$0xff]  ;;  %v639_v24 = vpack.c.bf16 %v143_v16, %v139_v15 }
  0x6e   :  { %v154_v23 = vld [vmem:[#allocation9 + $0x1f8] sm:$0xff]  ;;  %v671_v25 = vpack.c.bf16 %v145_v19, %v141_v17  ;;  %v641_v26 = vpack.c.bf16 %v152_v21, %v148_v20  ;;  %v147_v27 = vld [vmem:[#allocation9 + $0x1c0] sm:$0xff]  ;;  %v149_v29 = vld [vmem:[#allocation9 + $0x1d0] sm:$0xff] }
  0x6f   :  { %632 = vmatpush1.bf16.msra.mxu0 %v631_v63  ;;  %v151_v28 = vld [vmem:[#allocation9 + $0x1e0] sm:$0xff]  ;;  %v673_v30 = vpack.c.bf16 %v154_v23, %v150_v22  ;;  %v153_v31 = vld [vmem:[#allocation9 + $0x1f0] sm:$0xff]  ;;  %v330_v32 = vld [vmem:[#allocation11 + $0x8] sm:$0xff] }
  0x70   :  { %664 = vmatpush1.bf16.msra.mxu1 %v663_v1  ;;  %634 = vmatprep.subr.bf16.mxu0 %v633_v2  ;;  %v334_v33 = vld [vmem:[#allocation11 + $0x28] sm:$0xff]  ;;  %v332_v34 = vld [vmem:[#allocation11 + $0x18] sm:$0xff]  ;;  %v643_v36 = vpack.c.bf16 %v151_v28, %v147_v27  ;;  %v675_v37 = vpack.c.bf16 %v153_v31, %v149_v29  ;;  %v329_v39 = vld [vmem:[#allocation11] sm:$0xff] }
  0x71   :  { %666 = vmatprep.subr.bf16.mxu1 %v665_v6  ;;  %v336_v35 = vld [vmem:[#allocation11 + $0x38] sm:$0xff]  ;;  %v677_v38 = vpack.c.bf16 %v334_v33, %v330_v32  ;;  %v333_v40 = vld [vmem:[#allocation11 + $0x20] sm:$0xff]  ;;  %v331_v41 = vld [vmem:[#allocation11 + $0x10] sm:$0xff] }
  0x72   :  { %v709_v42 = vpack.c.bf16 %v336_v35, %v332_v34  ;;  %v335_v43 = vld [vmem:[#allocation11 + $0x30] sm:$0xff]  ;;  %v338_v44 = vld [vmem:[#allocation11 + $0x48] sm:$0xff]  ;;  %v340_v46 = vld [vmem:[#allocation11 + $0x58] sm:$0xff]  ;;  %v679_v49 = vpack.c.bf16 %v333_v40, %v329_v39 }
  0x73   :  { %636 = vmatpush1.bf16.msra.mxu0 %v635_v12  ;;  %v342_v45 = vld [vmem:[#allocation11 + $0x68] sm:$0xff]  ;;  %v344_v47 = vld [vmem:[#allocation11 + $0x78] sm:$0xff]  ;;  %v711_v50 = vpack.c.bf16 %v335_v43, %v331_v41  ;;  %v337_v52 = vld [vmem:[#allocation11 + $0x40] sm:$0xff] }
  0x74   :  { %668 = vmatpush1.bf16.msra.mxu1 %v667_v13  ;;  %638 = vmatprep.subr.bf16.mxu0 %v637_v14  ;;  %v90_v48 = vld [vmem:[#allocation3] sm:$0xff]  ;;  %v681_v51 = vpack.c.bf16 %v342_v45, %v338_v44  ;;  %v341_v53 = vld [vmem:[#allocation11 + $0x60] sm:$0xff]  ;;  %v339_v54 = vld [vmem:[#allocation11 + $0x50] sm:$0xff]  ;;  %v713_v55 = vpack.c.bf16 %v344_v47, %v340_v46 }
  0x75   :  { %670 = vmatprep.subr.bf16.mxu1 %v669_v18  ;;  %v343_v56 = vld [vmem:[#allocation11 + $0x70] sm:$0xff]  ;;  %v346_v57 = vld [vmem:[#allocation11 + $0x88] sm:$0xff]  ;;  %v348_v59 = vld [vmem:[#allocation11 + $0x98] sm:$0xff]  ;;  %v683_v61 = vpack.c.bf16 %v341_v53, %v337_v52 }
  0x76   :  { %v350_v58 = vld [vmem:[#allocation11 + $0xa8] sm:$0xff]  ;;  %v352_v60 = vld [vmem:[#allocation11 + $0xb8] sm:$0xff]  ;;  %v715_v62 = vpack.c.bf16 %v343_v56, %v339_v54  ;;  %v345_v1 = vld [vmem:[#allocation11 + $0x80] sm:$0xff] }
  0x77   :  { %640 = vmatpush1.bf16.msra.mxu0 %v639_v24  ;;  %v685_v63 = vpack.c.bf16 %v350_v58, %v346_v57  ;;  %v349_v2 = vld [vmem:[#allocation11 + $0xa0] sm:$0xff]  ;;  %v347_v3 = vld [vmem:[#allocation11 + $0x90] sm:$0xff]  ;;  %v717_v4 = vpack.c.bf16 %v352_v60, %v348_v59  ;;  %v354_v6 = vld [vmem:[#allocation11 + $0xc8] sm:$0xff] }
  0x78   :  { %672 = vmatpush1.bf16.msra.mxu1 %v671_v25  ;;  %642 = vmatprep.subr.bf16.mxu0 %v641_v26  ;;  %v351_v5 = vld [vmem:[#allocation11 + $0xb0] sm:$0xff]  ;;  %v358_v7 = vld [vmem:[#allocation11 + $0xe8] sm:$0xff]  ;;  %v356_v8 = vld [vmem:[#allocation11 + $0xd8] sm:$0xff]  ;;  %v687_v10 = vpack.c.bf16 %v349_v2, %v345_v1 }
  0x79   :  { %674 = vmatprep.subr.bf16.mxu1 %v673_v30  ;;  %v360_v9 = vld [vmem:[#allocation11 + $0xf8] sm:$0xff]  ;;  %v719_v11 = vpack.c.bf16 %v351_v5, %v347_v3  ;;  %v689_v12 = vpack.c.bf16 %v358_v7, %v354_v6  ;;  %v353_v13 = vld [vmem:[#allocation11 + $0xc0] sm:$0xff]  ;;  %v355_v15 = vld [vmem:[#allocation11 + $0xd0] sm:$0xff]  ;;  %v157_v5 = vlaneseq }
  0x7a   :  { %v357_v14 = vld [vmem:[#allocation11 + $0xe0] sm:$0xff]  ;;  %v721_v16 = vpack.c.bf16 %v360_v9, %v356_v8  ;;  %v359_v17 = vld [vmem:[#allocation11 + $0xf0] sm:$0xff]  ;;  %v362_v18 = vld [vmem:[#allocation11 + $0x108] sm:$0xff] }
  0x7b   :  { %644 = vmatpush1.bf16.msra.mxu0 %v643_v36  ;;  %v366_v19 = vld [vmem:[#allocation11 + $0x128] sm:$0xff]  ;;  %v364_v20 = vld [vmem:[#allocation11 + $0x118] sm:$0xff]  ;;  %v691_v22 = vpack.c.bf16 %v357_v14, %v353_v13  ;;  %v361_v24 = vld [vmem:[#allocation11 + $0x100] sm:$0xff]  ;;  %v158_v6 = vshrl.u32 %v157_v5, 7 }
  0x7c   :  { %676 = vmatpush1.bf16.msra.mxu1 %v675_v37  ;;  %678 = vmatprep.subr.bf16.mxu0 %v677_v38  ;;  %v368_v21 = vld [vmem:[#allocation11 + $0x138] sm:$0xff]  ;;  %v693_v23 = vpack.c.bf16 %v366_v19, %v362_v18  ;;  %v365_v25 = vld [vmem:[#allocation11 + $0x120] sm:$0xff]  ;;  %v363_v26 = vld [vmem:[#allocation11 + $0x110] sm:$0xff] }
  0x7d   :  { %710 = vmatprep.subr.bf16.mxu1 %v709_v42  ;;  %v725_v27 = vpack.c.bf16 %v368_v21, %v364_v20  ;;  %v367_v28 = vld [vmem:[#allocation11 + $0x130] sm:$0xff]  ;;  %v370_v29 = vld [vmem:[#allocation11 + $0x148] sm:$0xff]  ;;  %v372_v31 = vld [vmem:[#allocation11 + $0x158] sm:$0xff]  ;;  %v695_v33 = vpack.c.bf16 %v365_v25, %v361_v24  ;;  %v159_v7 = vsub.s32 0, %v158_v6  ;;  %v163_v9 = vsub.s32 1, %v158_v6 }
  0x7e   :  { %242 = vmatmul.mubr.f32.vlgmr.msra.gmra.mrb[0].mxu0 %v90_v48  ;;  %v374_v30 = vld [vmem:[#allocation11 + $0x168] sm:$0xff]  ;;  %v376_v32 = vld [vmem:[#allocation11 + $0x178] sm:$0xff]  ;;  %v727_v34 = vpack.c.bf16 %v367_v28, %v363_v26  ;;  %v369_v36 = vld [vmem:[#allocation11 + $0x140] sm:$0xff]  ;;  %v171_v13 = vsub.s32 3, %v158_v6 }
  0x7f   :  { %313 = vmatmul.mubr.f32.vlgmr.msra.gmra.mrb[0].mxu1 %v90_v48  ;;  %680 = vmatpush1.bf16.msra.mxu0 %v679_v49  ;;  %v697_v35 = vpack.c.bf16 %v374_v30, %v370_v29  ;;  %v373_v37 = vld [vmem:[#allocation11 + $0x160] sm:$0xff]  ;;  %v371_v38 = vld [vmem:[#allocation11 + $0x150] sm:$0xff]  ;;  %v729_v39 = vpack.c.bf16 %v376_v32, %v372_v31  ;;  %v378_v41 = vld [vmem:[#allocation11 + $0x188] sm:$0xff] }
  0x80   :  { %712 = vmatpush1.bf16.msra.mxu1 %v711_v50  ;;  %682 = vmatprep.subr.bf16.mxu0 %v681_v51  ;;  %v375_v40 = vld [vmem:[#allocation11 + $0x170] sm:$0xff]  ;;  %v382_v42 = vld [vmem:[#allocation11 + $0x1a8] sm:$0xff]  ;;  %v380_v43 = vld [vmem:[#allocation11 + $0x198] sm:$0xff]  ;;  %v699_v45 = vpack.c.bf16 %v373_v37, %v369_v36 }
  0x81   :  { %714 = vmatprep.subr.bf16.mxu1 %v713_v55  ;;  %457 = vmatprep.mubr.f32.mxu0 %v969_v0  ;;  %v384_v44 = vld [vmem:[#allocation11 + $0x1b8] sm:$0xff]  ;;  %v731_v46 = vpack.c.bf16 %v375_v40, %v371_v38  ;;  %v701_v47 = vpack.c.bf16 %v382_v42, %v378_v41  ;;  %v377_v48 = vld [vmem:[#allocation11 + $0x180] sm:$0xff]  ;;  %v379_v50 = vld [vmem:[#allocation11 + $0x190] sm:$0xff] }
  0x82   :  { %528 = vmatprep.mubr.f32.mxu1 %v969_v0  ;;  %v723_v0 = vpack.c.bf16 %v359_v17, %v355_v15  ;;  %v381_v49 = vld [vmem:[#allocation11 + $0x1a0] sm:$0xff]  ;;  %v733_v51 = vpack.c.bf16 %v384_v44, %v380_v43  ;;  %v383_v52 = vld [vmem:[#allocation11 + $0x1b0] sm:$0xff]  ;;  %v386_v53 = vld [vmem:[#allocation11 + $0x1c8] sm:$0xff] }
  0x83   :  { %684 = vmatpush1.bf16.msra.mxu0 %v683_v61  ;;  %v390_v54 = vld [vmem:[#allocation11 + $0x1e8] sm:$0xff]  ;;  %v388_v55 = vld [vmem:[#allocation11 + $0x1d8] sm:$0xff]  ;;  %v703_v57 = vpack.c.bf16 %v381_v49, %v377_v48  ;;  %v735_v58 = vpack.c.bf16 %v383_v52, %v379_v50  ;;  %v385_v60 = vld [vmem:[#allocation11 + $0x1c0] sm:$0xff] }
  0x84   :  { %716 = vmatpush1.bf16.msra.mxu1 %v715_v62  ;;  %686 = vmatprep.subr.bf16.mxu0 %v685_v63  ;;  %v392_v56 = vld [vmem:[#allocation11 + $0x1f8] sm:$0xff]  ;;  %v705_v59 = vpack.c.bf16 %v390_v54, %v386_v53  ;;  %v389_v61 = vld [vmem:[#allocation11 + $0x1e0] sm:$0xff]  ;;  %v387_v63 = vld [vmem:[#allocation11 + $0x1d0] sm:$0xff] }
  0x85   :  { %718 = vmatprep.subr.bf16.mxu1 %v717_v4  ;;  %v737_v62 = vpack.c.bf16 %v392_v56, %v388_v55  ;;  %v391_v1 = vld [vmem:[#allocation11 + $0x1f0] sm:$0xff]  ;;  %v707_v2 = vpack.c.bf16 %v389_v61, %v385_v60  ;;  %v155_v8 = vld [vmem:[%s1153_s5] sm:$0xf]  ;;  %v324_v32 = vld [vmem:[#allocation8] sm:$0xff]  ;;  %s970_s5 = smov [#allocation13]  }
  0x86   :  { %v739_v3 = vpack.c.bf16 %v391_v1, %v387_v63  ;;  %v323_v4 = vld [vmem:[#allocation6] sm:$0xff]  ;;  %v172_v21 = vrot.slane %v155_v8, %v171_v13  ;;  %s582_s27 = sshll.u32 %s970_s5, 4  ;;  %s583_s27 = int_to_ptr.vmem [resolvable:$true] %s582_s27 }
  0x87   :  { %688 = vmatpush1.bf16.msra.mxu0 %v687_v10  ;;  %v160_v10 = vrot.slane %v155_v8, %v159_v7  ;;  %s886_s23 = scalar_lea.vmem %s583_s27, 128  ;;  %p891_p13 = scmp.lt.s32.totalorder %s583_s27, %s583_s27 }
  0x88   :  { %720 = vmatpush1.bf16.msra.mxu1 %v719_v11  ;;  %690 = vmatprep.subr.bf16.mxu0 %v689_v12  ;;  %v164_v11 = vrot.slane %v155_v8, %v163_v9  ;;  %p887_p12 = scmp.ne.s32.totalorder %s583_s27, %s886_s23  ;;  %p892_p0 = scmp.lt.s32.totalorder %s886_s23, %s886_s23 }
  0x89   :  { %722 = vmatprep.subr.bf16.mxu1 %v721_v16 }
  0x8a   :  { %p893_p1 = por %p892_p0, %p891_p13 }
  0x8b   :  { %692 = vmatpush1.bf16.msra.mxu0 %v691_v22  ;;  %v167_v22 = vsub.s32 2, %v158_v6 }
  0x8c   :  { %724 = vmatpush1.bf16.msra.mxu1 %v723_v0  ;;  %694 = vmatprep.subr.bf16.mxu0 %v693_v23  ;;  %p894_p2 = pnand %p893_p1, %p887_p12 }
  0x8d   :  { %726 = vmatprep.subr.bf16.mxu1 %v725_v27  ;;  %v168_v23 = vrot.slane %v155_v8, %v167_v22 }
  0x8f   :  { %696 = vmatpush1.bf16.msra.mxu0 %v695_v33 }
  0x90   :  { %728 = vmatpush1.bf16.msra.mxu1 %v727_v34  ;;  %698 = vmatprep.subr.bf16.mxu0 %v697_v35 }
  0x91   :  { %730 = vmatprep.subr.bf16.mxu1 %v729_v39 }
  0x93   :  { %700 = vmatpush1.bf16.msra.mxu0 %v699_v45 }
  0x94   :  { %732 = vmatpush1.bf16.msra.mxu1 %v731_v46  ;;  %702 = vmatprep.subr.bf16.mxu0 %v701_v47 }
  0x95   :  { %734 = vmatprep.subr.bf16.mxu1 %v733_v51 }
  0x97   :  { %704 = vmatpush1.bf16.msra.mxu0 %v703_v57 }
  0x98   :  { %736 = vmatpush1.bf16.msra.mxu1 %v735_v58  ;;  %706 = vmatprep.subr.bf16.mxu0 %v705_v59 }
  0x99   :  { %738 = vmatprep.subr.bf16.mxu1 %v737_v62 }
  0x9b   :  { %708 = vmatpush1.bf16.msra.mxu0 %v707_v2 }
  0x9c   :  { %740 = vmatpush1.bf16.msra.mxu1 %v739_v3 }
  0x9e   :  { %458 = vmatmul.mubr.f32.vlgmr.msra.gmra.mrb[0].mxu0 %v323_v4 }
  0x9f   :  { %529 = vmatmul.mubr.f32.vlgmr.msra.gmra.mrb[0].mxu1 %v323_v4 }
 0x171   :  { %v459_v12 = vpop.f32.mrb[0].mxu0 }
 0x172   :  { %v741_v14 = vadd.f32 %v459_v12, %v160_v10  ;;  %v530_v15 = vpop.f32.mrb[0].mxu1  ;;  %v461_v16 = vpop.f32.mrb[1].mxu0 }
 0x173   :  { %v742_v17 = vadd.f32 %v461_v16, %v164_v11  ;;  %v532_v18 = vpop.f32.mrb[1].mxu1  ;;  %v743_v25 = vadd.f32 %v530_v15, %v168_v23 }
 0x174   :  { %v610_v19 = vmul.f32 -1.442695, %v741_v14  ;;  %v744_v0 = vadd.f32 %v532_v18, %v172_v21 }
 0x175   :  { %v611_v20 = vmul.f32 -1.442695, %v742_v17 }
 0x176   :  { %760 = vpow2.f32 %v610_v19  ;;  %v612_v24 = vmul.f32 -1.442695, %v744_v0 }
 0x177   :  { %762 = vpow2.f32 %v611_v20 }
 0x178   :  { %764 = vpow2.f32 %v612_v24 }
 0x179   :  { %766 = vtanh.f32 %v743_v25 }
 0x180   :  { %v761_v26 = vpop.eup %760 }
 0x181   :  { %v763_v27 = vpop.eup %762  ;;  %v542_v28 = vadd.f32 1.0, %v761_v26 }
 0x182   :  { %v548_v29 = vadd.f32 1.0, %v763_v27  ;;  %v765_v30 = vpop.eup %764 }
 0x183   :  { %768 = vrcp.f32 %v542_v28  ;;  %v767_v31 = vpop.eup %766  ;;  %v555_v36 = vadd.f32 1.0, %v765_v30 }
 0x184   :  { %770 = vrcp.f32 %v548_v29 }
 0x185   :  { %772 = vrcp.f32 %v555_v36 }
 0x18d   :  { %v769_v33 = vpop.eup %768 }
 0x18e   :  { %v771_v34 = vpop.eup %770  ;;  %v559_v35 = vmul.f32 %v769_v33, %v767_v31 }
 0x18f   :  { %v558_v37 = vmul.f32 %v771_v34, %v324_v32  ;;  %v773_v39 = vpop.eup %772 }
 0x191   :  { %v560_v38 = vadd.f32 %v559_v35, %v558_v37 }
 0x193   :  { %774 = vtanh.f32 %v560_v38  ;;  %565 = vst [vmem:[#allocation15] sm:$0xff] %v560_v38 }
 0x19d   :  { %v775_v40 = vpop.eup %774 }
 0x19e   :  { %v562_v41 = vmul.f32 %v775_v40, %v773_v39 }
 0x1a0   :  { %564 = vst [vmem:[#allocation13] sm:$0xff] %v562_v41  ;;  %563 = vst [vmem:[#allocation12] sm:$0xff] %v562_v41 }
 0x1a1   :  { %897 = shalt.err (!%p894_p2)
}
 0x1a2   :  { %s898_s26 = scalar_lea.hbm %s1155_s7, 128 }
 0x1a3   :  { %p899_p3 = scmp.ne.s32.totalorder %s1155_s7, %s898_s26  ;;  %p902_p4 = scmp.lt.u32.totalorder %s898_s26, %s1155_s7 }
 0x1a5   :  { %p904_p5 = pnand %p902_p4, %p899_p3 }
 0x1a7   :  { %907 = shalt.err (!%p904_p5)
}
 0x1a8   :  { %585 = dma.vmem_to_hbm [thread:$0]  %s583_s27, 128, %s1155_s7, [#allocation14]  }
 0x1a9   :  { %s908_s13 = scalar_lea.vmem %s1098_s20, 128  ;;  %p913_p7 = scmp.lt.s32.totalorder %s1098_s20, %s1098_s20 }
 0x1aa   :  { %p909_p6 = scmp.ne.s32.totalorder %s1098_s20, %s908_s13  ;;  %p914_p8 = scmp.lt.s32.totalorder %s908_s13, %s908_s13 }
 0x1ac   :  { %p915_p9 = por %p914_p8, %p913_p7 }
 0x1ae   :  { %p916_p10 = pnand %p915_p9, %p909_p6 }
 0x1b0   :  { %919 = shalt.err (!%p916_p10)
}
 0x1b1   :  { %s920_s16 = scalar_lea.hbm %s1154_s6, 128 }
 0x1b2   :  { %p921_p11 = scmp.ne.s32.totalorder %s1154_s6, %s920_s16  ;;  %p924_p12 = scmp.lt.u32.totalorder %s920_s16, %s1154_s6 }
 0x1b4   :  { %p926_p13 = pnand %p924_p12, %p921_p11 }
 0x1b6   :  { %929 = shalt.err (!%p926_p13)
}
 0x1b7   :  { %575 = dma.vmem_to_hbm [thread:$0]  %s1098_s20, 128, %s1154_s6, [#allocation5]  }
 0x1b8   :  { %s930_s12 = scalar_lea.vmem %s1100_s22, 128  ;;  %p935_p1 = scmp.lt.s32.totalorder %s1100_s22, %s1100_s22 }
 0x1b9   :  { %p931_p0 = scmp.ne.s32.totalorder %s1100_s22, %s930_s12  ;;  %p936_p2 = scmp.lt.s32.totalorder %s930_s12, %s930_s12 }
 0x1bb   :  { %p937_p3 = por %p936_p2, %p935_p1 }
 0x1bd   :  { %p938_p4 = pnand %p937_p3, %p931_p0 }
 0x1bf   :  { %941 = shalt.err (!%p938_p4)
}
 0x1c0   :  { %s942_s5 = scalar_lea.hbm %s1156_s8, 128 }
 0x1c1   :  { %p943_p5 = scmp.ne.s32.totalorder %s1156_s8, %s942_s5  ;;  %p946_p6 = scmp.lt.u32.totalorder %s942_s5, %s1156_s8 }
 0x1c3   :  { %p948_p7 = pnand %p946_p6, %p943_p5 }
 0x1c5   :  { %951 = shalt.err (!%p948_p7)
}
 0x1c6   :  { %595 = dma.vmem_to_hbm [thread:$0]  %s1100_s22, 128, %s1156_s8, [#allocation14]  }
 0x1c7   :  { %958 = dma.done.wait [#allocation5], 128  }
 0x1c8   :  { %959 = vsyncadd [#allocation5], 4294967168 }
 0x1c9   :  { %960 = dma.done.wait [#allocation14], 256  }
 0x1ca   :  { %961 = vsyncadd [#allocation14], 4294967040 }
 0x1cb   :  { %605 = vsyncpa [#allocation4], 1 }
 0x1cc   :  { %606 = vsyncpa [#allocation7], 1 }
 0x1cd   :  { %607 = vsyncpa [#allocation10], 1 }
 0x1ce   :  { %608 = vsyncpa [#allocation5], 1 }
 0x1cf   :  { %609 = vsyncpa [#allocation14], 1 }

</bundles_post_ra>
